<compile_context>
chip_gen: v7x
topology: tpu7x:2x2x1
jax: 0.10.0
libtpu: 0.0.40
codegen_flags: <defaults>
</compile_context>

<pallas_src>
import functools

import numpy as np
import jax
import jax.numpy as jnp
from jax.experimental import pallas as pl
from jax.experimental.pallas import tpu as pltpu


# Conv2d hyper-parameters of the wrapped model: Conv2d(C, OC, 3, stride=2, padding=1).
_KH = _KW = 3
_STRIDE = 2
_PAD = 1


# ----------------------------------------------------------------------------
# Fused Pallas kernel: in-kernel im2col + conv GEMM + (select+bilinear) GEMM + CE
# ----------------------------------------------------------------------------
def _fused_seg_kernel(xp_ref, w4_ref, b_ref, bt_ref, labels_ref,
                      ups_ref, loss_ref, cols_ref, *, shifts):
    # xp_ref     : [S*S*C, LIN]     f32  phase-split padded input
    #                                    rows  = (phase_h, phase_w, channel)
    #                                    lanes = (image, block_row, block_col)
    # w4_ref     : [OC, 4*S*S*C]    f32  conv weights regrouped by (shift, ph, pw, c)
    # b_ref      : [OC, 1]          f32  conv bias
    # bt_ref     : [LCONV, N*HlWl]  f32  fused valid-lane-select + bilinear upsample
    # labels_ref : [1, N*HlWl]      i32  labels, pixels on lanes
    # ups_ref    : [N, OC, HlWl]    f32  upsampled logits            (output #1)
    # loss_ref   : [1]              f32  mean CE loss, SMEM          (output #2)
    # cols_ref   : [4*S*S*C, LCONV] f32  VMEM scratch holding the shifted copies
    npqc = xp_ref.shape[0]
    lconv = cols_ref.shape[1]
    n_img, _, hlwl = ups_ref.shape

    # -- in-kernel im2col: every 3x3/stride-2 tap is one of only 4 lane shifts of
    #    the phase-split input, so 4 slice-loads + sublane-aligned stores build
    #    the whole K dimension of the conv GEMM (no per-tap / per-image work).
    for s, d in enumerate(shifts):
        cols_ref[s * npqc:(s + 1) * npqc, :] = xp_ref[:, d:d + lconv]

    # -- ONE conv GEMM over the whole batch: classes on sublanes, pixels on lanes.
    conv = jnp.dot(w4_ref[...], cols_ref[...],
                   preferred_element_type=jnp.float32)               # [OC, LCONV]

    # -- ONE fused (drop-garbage-lanes + bilinear-upsample) GEMM; bias added once
    #    afterwards (every bilinear row sums to 1, so this is exact).
    ups = jnp.dot(conv, bt_ref[...],
                  preferred_element_type=jnp.float32) + b_ref[...]   # [OC, N*HlWl]

    # -- write logits per image: 256-lane-aligned, lane-dense stores.
    for n in range(n_img):
        ups_ref[n] = ups[:, n * hlwl:(n + 1) * hlwl]

    # -- cross-entropy over the whole [OC, N*HlWl] slab.  The only cross-lane
    #    reduction is the single jnp.sum at the very end; the class reductions
    #    (max / sum over OC) stay on the cheap sublane axis.
    m = jnp.max(ups, axis=0, keepdims=True)                           # [1, N*HlWl]
    lse = m + jnp.log(jnp.sum(jnp.exp(ups - m), axis=0, keepdims=True))
    cls = jax.lax.broadcasted_iota(jnp.int32, ups.shape, 0)
    picked = jnp.sum(jnp.where(cls == labels_ref[...], ups, 0.0),
                     axis=0, keepdims=True)                           # [1, N*HlWl]
    # TODO(synk): out-of-range / ignore_index (-100) labels are not handled the
    # way torch.nn.CrossEntropyLoss would handle them.
    loss_ref[0] = jnp.sum(lse - picked) * (1.0 / (n_img * hlwl))


# ----------------------------------------------------------------------------
# Trace-time helpers (compile-time constants / layout plumbing only)
# ----------------------------------------------------------------------------
def _bilinear_matrix_np(out_size, in_size):
    """PyTorch F.interpolate(mode='bilinear', align_corners=False) as [out, in]."""
    scale = in_size / out_size
    i = np.arange(out_size, dtype=np.float64)
    src = np.maximum(scale * (i + 0.5) - 0.5, 0.0)
    i0 = np.minimum(np.floor(src).astype(np.int64), in_size - 1)
    i1 = np.minimum(i0 + 1, in_size - 1)
    l1 = src - i0
    l0 = 1.0 - l1
    M = np.zeros((out_size, in_size), dtype=np.float32)
    M[np.arange(out_size), i0] += l0.astype(np.float32)
    M[np.arange(out_size), i1] += l1.astype(np.float32)
    return M


# ----------------------------------------------------------------------------
# FullModel.forward equivalent (single fused pallas_call)
# ----------------------------------------------------------------------------
def full_model_forward(params, inputs, labels):
    w, b = params["conv_w"], params["conv_b"]           # [OC, C, 3, 3], [OC]
    OC = w.shape[0]
    N, C, H, W = inputs.shape
    Hl, Wl = int(labels.shape[1]), int(labels.shape[2])
    OH = (H + 2 * _PAD - _KH) // _STRIDE + 1             # 8
    OW = (W + 2 * _PAD - _KW) // _STRIDE + 1             # 8
    assert H == OH * _STRIDE and W == OW * _STRIDE
    Hb, Wb = OH + 1, OW + 1                               # conv-padded block grid 9x9
    PIMG = Hb * Wb                                        # 81 lanes per image
    LIN = N * PIMG                                        # 162 input lanes
    LCONV = (N - 1) * PIMG + (OH - 1) * Wb + OW           # 152 lanes holding valid outputs
    HlWl = Hl * Wl                                        # 256
    SS = _STRIDE * _STRIDE

    # --- phase-split (space-to-depth) input: 4 layout-only XLA ops -----------
    # xp_flat[(p*2+q)*C + c, n*PIMG + bh*Wb + bw] = x[n, c, 2*(bh-1)+p, 2*(bw-1)+q]
    # (bh == 0 / bw == 0 hold the conv zero-padding).
    xr = inputs.reshape(N, C, OH, _STRIDE, OW, _STRIDE)
    xt = xr.transpose(3, 5, 1, 0, 2, 4)                   # [p, q, C, N, OH, OW]
    xp = jnp.pad(xt, ((0, 0),) * 4 + ((1, 0), (1, 0)))    # [p, q, C, N, Hb, Wb]
    xp_flat = xp.reshape(SS * C, LIN)                      # [16, 162]

    # --- conv weights regrouped by (lane shift, phase, channel) --------------
    shifts = (0, 1, Wb, Wb + 1)
    P = np.zeros((_KH, _KW, len(shifts), _STRIDE, _STRIDE), np.float32)
    for ki in range(_KH):
        p = (ki - _PAD) % _STRIDE
        roff = (ki - _PAD - p) // _STRIDE + _PAD
        for kj in range(_KW):
            q = (kj - _PAD) % _STRIDE
            coff = (kj - _PAD - q) // _STRIDE + _PAD
            P[ki, kj, shifts.index(roff * Wb + coff), p, q] = 1.0
    w4 = jnp.einsum("ocij,ijdpq->odpqc", w, jnp.asarray(P))
    w4 = w4.reshape(OC, len(shifts) * SS * C)              # [5, 64]
    b_col = b.reshape(OC, 1)

    # --- fused valid-lane-select + bilinear-upsample matrix (trace-time const)
    # When (OH,OW)==(Hl,Wl) the bilinear part degenerates to the identity; the
    # matrix is still needed here because it also compacts the garbage lanes of
    # the shift-trick conv output into the per-image pixel layout.
    # TODO(synk): at scaled spatial sizes build this as two separable resize
    # GEMMs (Wx then Wy) in bf16 instead of a dense kron, add a 'parallel' grid
    # over pixel tiles so both v7x TensorCores are used, and cast the GEMM
    # operands to bf16 on v6e/v7x (keep the softmax math in f32 for v5e).
    Wy = _bilinear_matrix_np(Hl, OH)                        # [Hl, OH]
    Wx = _bilinear_matrix_np(Wl, OW)                        # [Wl, OW]
    B_img = np.kron(Wy, Wx)                                 # [Hl*Wl, OH*OW]
    bt_sel = np.zeros((LCONV, N * HlWl), np.float32)
    o_idx = (np.arange(OH)[:, None] * Wb + np.arange(OW)[None, :]).reshape(-1)
    for n in range(N):
        bt_sel[n * PIMG + o_idx, n * HlWl:(n + 1) * HlWl] = B_img.T
    bt_sel = jnp.asarray(bt_sel)                            # [152, 512]

    labels_row = labels.reshape(1, N * HlWl).astype(jnp.int32)

    # Everything fits a single VMEM block (<0.5 MB), so no grid is needed at
    # these shapes: one launch, zero intermediate HBM traffic.
    ups, loss = pl.pallas_call(
        functools.partial(_fused_seg_kernel, shifts=shifts),
        out_shape=(
            jax.ShapeDtypeStruct((N, OC, HlWl), jnp.float32),
            jax.ShapeDtypeStruct((1,), jnp.float32),
        ),
        in_specs=[pl.BlockSpec(memory_space=pltpu.MemorySpace.VMEM)] * 5,
        out_specs=(
            pl.BlockSpec(memory_space=pltpu.MemorySpace.VMEM),
            pl.BlockSpec(memory_space=pltpu.MemorySpace.SMEM),
        ),
        scratch_shapes=[pltpu.VMEM((len(shifts) * SS * C, LCONV), jnp.float32)],
    )(xp_flat, w4, b_col, bt_sel, labels_row)

    outputs = ups.reshape(N, OC, Hl, Wl)     # contiguous -> free reshape
    # loss already has shape (1,)  (== torch.unsqueeze(loss, 0))
    return loss, outputs


# ----------------------------------------------------------------------------
# Pure-XLA reference of the same forward pass (runtime self-check only)
# ----------------------------------------------------------------------------
def _reference_forward(params, inputs, labels):
    w, b = params["conv_w"], params["conv_b"]
    N = inputs.shape[0]
    OC = w.shape[0]
    Hl, Wl = labels.shape[1], labels.shape[2]
    conv = jax.lax.conv_general_dilated(
        inputs, w, window_strides=(_STRIDE, _STRIDE),
        padding=((_PAD, _PAD), (_PAD, _PAD)),
        dimension_numbers=("NCHW", "OIHW", "NCHW")) + b.reshape(1, OC, 1, 1)
    Wy = jnp.asarray(_bilinear_matrix_np(Hl, conv.shape[2]))
    Wx = jnp.asarray(_bilinear_matrix_np(Wl, conv.shape[3]))
    ups = jnp.einsum("nchw,yh,xw->ncyx", conv, Wy, Wx)
    logp = jax.nn.log_softmax(ups.reshape(N, OC, Hl * Wl), axis=1)
    picked = jnp.take_along_axis(
        logp, labels.reshape(N, 1, Hl * Wl).astype(jnp.int32), axis=1)
    loss = -jnp.mean(picked)
    return loss.reshape(1), ups


# ----------------------------------------------------------------------------
if __name__ == "__main__":
    key = jax.random.PRNGKey(0)
    k_in, k_lab, k_w, k_b = jax.random.split(key, 4)

    N, C_IN, H, W = 2, 4, 16, 16
    N_CLASSES = 5

    inputs = jax.random.normal(k_in, (N, C_IN, H, W), dtype=jnp.float32)
    labels = jax.random.randint(k_lab, (N, H, W), 0, N_CLASSES, dtype=jnp.int32)

    params = {
        "conv_w": 0.1 * jax.random.normal(
            k_w, (N_CLASSES, C_IN, 3, 3), dtype=jnp.float32),
        "conv_b": 0.1 * jax.random.normal(
            k_b, (N_CLASSES,), dtype=jnp.float32),
    }

    loss, outputs = jax.jit(full_model_forward)(params, inputs, labels)
    jax.block_until_ready((loss, outputs))

    assert loss.shape == (1,)
    assert outputs.shape == (N, N_CLASSES, H, W)
    assert bool(jnp.isfinite(loss).all())
    assert bool(jnp.isfinite(outputs).all())

    # Runtime self-check against the pure-XLA reference (tolerances cover the
    # default-precision MXU / XLA matmul paths).
    ref_loss, ref_out = jax.jit(_reference_forward)(params, inputs, labels)
    assert bool(jnp.allclose(outputs, ref_out, atol=3e-2, rtol=3e-2)), "logits mismatch"
    assert bool(jnp.allclose(loss, ref_loss, atol=3e-2, rtol=3e-2)), "loss mismatch"

    print("KERNEL_OK")
</pallas_src>

<mosaic_0001>
module attributes {stable_mosaic.version = 11 : i64} {
  func.func @_fused_seg_kernel(%arg0: memref<16x162xf32, #tpu.memory_space<vmem>>, %arg1: memref<5x64xf32, #tpu.memory_space<vmem>>, %arg2: memref<5x1xf32, #tpu.memory_space<vmem>>, %arg3: memref<152x512xf32, #tpu.memory_space<vmem>>, %arg4: memref<1x512xi32, #tpu.memory_space<vmem>>, %arg5: memref<2x5x256xf32, #tpu.memory_space<vmem>>, %arg6: memref<1xf32, #tpu.memory_space<smem>>, %arg7: memref<64x152xf32, #tpu.memory_space<vmem>>) attributes {dimension_semantics = [], scalar_prefetch = 0 : i64, scratch_operands = 1 : i64, tpu.core_type = #tpu.core_type<tc>} {
    %c0 = arith.constant 0 : index
    %c0_0 = arith.constant 0 : index
    %0 = vector.load %arg0[%c0, %c0_0] : memref<16x162xf32, #tpu.memory_space<vmem>>, vector<16x152xf32>
    %c0_1 = arith.constant 0 : index
    %c0_2 = arith.constant 0 : index
    %1 = vector.load %arg7[%c0_1, %c0_2] : memref<64x152xf32, #tpu.memory_space<vmem>>, vector<16x152xf32>
    tpu.vector_store %arg7[%c0_1, %c0_2], %0 {strides = array<i32>} : memref<64x152xf32, #tpu.memory_space<vmem>>, vector<16x152xf32>,
    %c0_3 = arith.constant 0 : index
    %c1 = arith.constant 1 : index
    %2 = vector.load %arg0[%c0_3, %c1] : memref<16x162xf32, #tpu.memory_space<vmem>>, vector<16x152xf32>
    %c16 = arith.constant 16 : index
    %c0_4 = arith.constant 0 : index
    %3 = vector.load %arg7[%c16, %c0_4] : memref<64x152xf32, #tpu.memory_space<vmem>>, vector<16x152xf32>
    tpu.vector_store %arg7[%c16, %c0_4], %2 {strides = array<i32>} : memref<64x152xf32, #tpu.memory_space<vmem>>, vector<16x152xf32>,
    %c0_5 = arith.constant 0 : index
    %c9 = arith.constant 9 : index
    %4 = vector.load %arg0[%c0_5, %c9] : memref<16x162xf32, #tpu.memory_space<vmem>>, vector<16x152xf32>
    %c32 = arith.constant 32 : index
    %c0_6 = arith.constant 0 : index
    %5 = vector.load %arg7[%c32, %c0_6] : memref<64x152xf32, #tpu.memory_space<vmem>>, vector<16x152xf32>
    tpu.vector_store %arg7[%c32, %c0_6], %4 {strides = array<i32>} : memref<64x152xf32, #tpu.memory_space<vmem>>, vector<16x152xf32>,
    %c0_7 = arith.constant 0 : index
    %c10 = arith.constant 10 : index
    %6 = vector.load %arg0[%c0_7, %c10] : memref<16x162xf32, #tpu.memory_space<vmem>>, vector<16x152xf32>
    %c48 = arith.constant 48 : index
    %c0_8 = arith.constant 0 : index
    %7 = vector.load %arg7[%c48, %c0_8] : memref<64x152xf32, #tpu.memory_space<vmem>>, vector<16x152xf32>
    tpu.vector_store %arg7[%c48, %c0_8], %6 {strides = array<i32>} : memref<64x152xf32, #tpu.memory_space<vmem>>, vector<16x152xf32>,
    %c0_9 = arith.constant 0 : index
    %c0_10 = arith.constant 0 : index
    %8 = vector.load %arg1[%c0_9, %c0_10] : memref<5x64xf32, #tpu.memory_space<vmem>>, vector<5x64xf32>
    %c0_11 = arith.constant 0 : index
    %c0_12 = arith.constant 0 : index
    %9 = vector.load %arg7[%c0_11, %c0_12] : memref<64x152xf32, #tpu.memory_space<vmem>>, vector<64x152xf32>
    %cst = arith.constant dense<0.000000e+00> : vector<5x152xf32>
    %10 = tpu.matmul %8, %9, %cst {dimension_numbers = #tpu.dot_dimension_numbers<[1], [0], [0], [1], [0, 0, 1, 1], [], []>} : vector<5x64xf32>, vector<64x152xf32>, vector<5x152xf32> -> vector<5x152xf32>
    %c0_13 = arith.constant 0 : index
    %c0_14 = arith.constant 0 : index
    %11 = vector.load %arg3[%c0_13, %c0_14] : memref<152x512xf32, #tpu.memory_space<vmem>>, vector<152x512xf32>
    %cst_15 = arith.constant dense<0.000000e+00> : vector<5x512xf32>
    %12 = tpu.matmul %10, %11, %cst_15 {dimension_numbers = #tpu.dot_dimension_numbers<[1], [0], [0], [1], [0, 0, 1, 1], [], []>} : vector<5x152xf32>, vector<152x512xf32>, vector<5x512xf32> -> vector<5x512xf32>
    %c0_16 = arith.constant 0 : index
    %c0_17 = arith.constant 0 : index
    %13 = vector.load %arg2[%c0_16, %c0_17] : memref<5x1xf32, #tpu.memory_space<vmem>>, vector<5x1xf32>
    %14 = vector.broadcast %13 : vector<5x1xf32> to vector<5x512xf32>
    %15 = arith.addf %12, %14 : vector<5x512xf32>
    %16 = vector.extract_strided_slice %15 {offsets = [0, 0], sizes = [5, 256], strides = [1, 1]} : vector<5x512xf32> to vector<5x256xf32>
    %c0_18 = arith.constant 0 : index
    %c0_19 = arith.constant 0 : index
    %c0_20 = arith.constant 0 : index
    %17 = vector.load %arg5[%c0_18, %c0_19, %c0_20] : memref<2x5x256xf32, #tpu.memory_space<vmem>>, vector<1x5x256xf32>
    %18 = vector.shape_cast %17 : vector<1x5x256xf32> to vector<5x256xf32>
    %19 = vector.shape_cast %16 : vector<5x256xf32> to vector<1x5x256xf32>
    tpu.vector_store %arg5[%c0_18, %c0_19, %c0_20], %19 {strides = array<i32>} : memref<2x5x256xf32, #tpu.memory_space<vmem>>, vector<1x5x256xf32>,
    %20 = vector.extract_strided_slice %15 {offsets = [0, 256], sizes = [5, 256], strides = [1, 1]} : vector<5x512xf32> to vector<5x256xf32>
    %c1_21 = arith.constant 1 : index
    %c0_22 = arith.constant 0 : index
    %c0_23 = arith.constant 0 : index
    %21 = vector.load %arg5[%c1_21, %c0_22, %c0_23] : memref<2x5x256xf32, #tpu.memory_space<vmem>>, vector<1x5x256xf32>
    %22 = vector.shape_cast %21 : vector<1x5x256xf32> to vector<5x256xf32>
    %23 = vector.shape_cast %20 : vector<5x256xf32> to vector<1x5x256xf32>
    tpu.vector_store %arg5[%c1_21, %c0_22, %c0_23], %23 {strides = array<i32>} : memref<2x5x256xf32, #tpu.memory_space<vmem>>, vector<1x5x256xf32>,
    %cst_24 = arith.constant dense<0xFF800000> : vector<512xf32>
    %24 = vector.multi_reduction <maximumf>, %15, %cst_24 [0] : vector<5x512xf32> to vector<512xf32>
    %25 = vector.shape_cast %24 : vector<512xf32> to vector<1x512xf32>
    %26 = vector.broadcast %25 : vector<1x512xf32> to vector<5x512xf32>
    %27 = arith.subf %15, %26 : vector<5x512xf32>
    %28 = math.exp %27 : vector<5x512xf32>
    %cst_25 = arith.constant dense<0.000000e+00> : vector<512xf32>
    %29 = vector.multi_reduction <add>, %28, %cst_25 [0] : vector<5x512xf32> to vector<512xf32>
    %30 = vector.shape_cast %29 : vector<512xf32> to vector<1x512xf32>
    %31 = math.log %30 : vector<1x512xf32>
    %32 = arith.addf %25, %31 : vector<1x512xf32>
    %33 = tpu.iota {dimensions = array<i32: 0>} : vector<5x512xi32>
    %c0_26 = arith.constant 0 : index
    %c0_27 = arith.constant 0 : index
    %34 = vector.load %arg4[%c0_26, %c0_27] : memref<1x512xi32, #tpu.memory_space<vmem>>, vector<1x512xi32>
    %35 = vector.broadcast %34 : vector<1x512xi32> to vector<5x512xi32>
    %36 = arith.cmpi eq, %33, %35 : vector<5x512xi32>
    %cst_28 = arith.constant 0.000000e+00 : f32
    %37 = vector.broadcast %cst_28 : f32 to vector<5x512xf32>
    %38 = arith.select %36, %15, %37 : vector<5x512xi1>, vector<5x512xf32>
    %cst_29 = arith.constant dense<0.000000e+00> : vector<512xf32>
    %39 = vector.multi_reduction <add>, %38, %cst_29 [0] : vector<5x512xf32> to vector<512xf32>
    %40 = vector.shape_cast %39 : vector<512xf32> to vector<1x512xf32>
    %41 = arith.subf %32, %40 : vector<1x512xf32>
    %42 = vector.shape_cast %41 : vector<1x512xf32> to vector<1x1x512xf32>
    %cst_30 = arith.constant dense<0.000000e+00> : vector<1xf32>
    %43 = vector.multi_reduction <add>, %42, %cst_30 [1, 2] : vector<1x1x512xf32> to vector<1xf32>
    %44 = vector.shape_cast %43 : vector<1xf32> to vector<1x1x1xf32>
    %45 = vector.extract %44[0, 0, 0] : f32 from vector<1x1x1xf32>
    %cst_31 = arith.constant 0.001953125 : f32
    %46 = arith.mulf %45, %cst_31 : f32
    %c0_32 = arith.constant 0 : index
    %47 = memref.load %arg6[%c0_32] : memref<1xf32, #tpu.memory_space<smem>>
    memref.store %46, %arg6[%c0_32] : memref<1xf32, #tpu.memory_space<smem>>
    return
  }
}

</mosaic_0001>

<bundles_post_ra>
// kernel: full_model_forward.1
= control target key start
LH: loop header
LB: loop body
LE: loop exit
PB: predicated region body
PF: predicated region fallthrough
CT: control target
= control target key end

     0   :  { %s744_s27 = smov 127   ;;  %vm28_vm0 = vcmask 195584   ;;  %s1120_s0 = inlined_call_operand.vmem [shape: f32[16,162], index: 0, kind: input, shape index: {}]   ;;  %s1121_s1 = inlined_call_operand.vmem [shape: f32[5,64], index: 1, kind: input, shape index: {}]   ;;  %s1122_s2 = inlined_call_operand.vmem [shape: f32[5,1], index: 2, kind: input, shape index: {}]   ;;  %s1123_s3 = inlined_call_operand.vmem [shape: f32[152,512], index: 3, kind: input, shape index: {}]   ;;  %s1124_s4 = inlined_call_operand.vmem [shape: s32[1,512], index: 4, kind: input, shape index: {}]   ;;  %s1125_s5 = inlined_call_operand.vmem [shape: f32[2,5,256], index: 5, kind: output, shape index: {0}]   ;;  %s1126_s6 = inlined_call_operand.hbm [shape: f32[1], index: 6, kind: output, shape index: {1}]  }
   0x1   :  { %v34_v0 = vld [vmem:[%s1120_s0 + $0x10] sm:$0xff]  ;;  %v32_v1 = vld [vmem:[%s1120_s0] sm:$0xff]  ;;  %v35_v2 = vld [vmem:[%s1120_s0 + $0x18] sm:$0xff] }
   0x2   :  { %44 = vrot.lane.b32.xlu1 %v34_v0, %s744_s27  ;;  %40 = vrot.lane.b32.xlu0 %v32_v1, %s744_s27  ;;  %v33_v3 = vld [vmem:[%s1120_s0 + $0x8] sm:$0xff] }
   0x3   :  { %12 = vsyncpa [#allocation4], 0  ;;  %29 = vst.msk [vmem:[#allocation2 + $0x8] sm:$0xff] %vm28_vm0, %v33_v3  ;;  %s745_s30 = smov 119   ;;  %v621_v7 = vpack.c.bf16 %v34_v0, %v32_v1  ;;  %s746_s0 = smov 118   ;;  %v747_v8 = vmov 0.0  }
   0x4   :  { %31 = vst.msk [vmem:[#allocation2 + $0x18] sm:$0xff] %vm28_vm0, %v35_v2  ;;  %198 = vmatprep.mubr.f32.mxu0 %v747_v8  ;;  %v206_v9 = vld [vmem:[%s1123_s3 + $0x8] sm:$0xff]  ;;  %v205_v12 = vld [vmem:[%s1123_s3] sm:$0xff]  ;;  %vm48_vm1 = vcmask 1039360   ;;  %vm75_vm2 = vcmask 973824   ;;  %vm102_vm3 = vcmask 965632  }
   0x5   :  { %v210_v10 = vld [vmem:[%s1123_s3 + $0x28] sm:$0xff]  ;;  %v209_v13 = vld [vmem:[%s1123_s3 + $0x20] sm:$0xff]  ;;  %vm130_vm4 = vcmask 523264   ;;  %vm437_vm5 = vcmask 1044480   ;;  %vm577_vm10 = vcmask 1040384   ;;  %s732_s20 = scalar_lea.hbm %s1126_s6, 16 }
   0x6   :  { %46 = vrot.lane.b32.xlu1 %v35_v2, %s744_s27  ;;  %42 = vrot.lane.b32.xlu0 %v33_v3, %s744_s27  ;;  %v635_v11 = vpack.c.bf16 %v210_v10, %v206_v9  ;;  %v637_v14 = vpack.c.bf16 %v209_v13, %v205_v12  ;;  %v214_v15 = vld [vmem:[%s1123_s3 + $0x48] sm:$0xff]  ;;  %v213_v18 = vld [vmem:[%s1123_s3 + $0x40] sm:$0xff]  ;;  %p733_p0 = scmp.ne.s32.totalorder %s1126_s6, %s732_s20  ;;  %p736_p1 = scmp.lt.u32.totalorder %s732_s20, %s1126_s6 }
   0x7   :  { %v218_v16 = vld [vmem:[%s1123_s3 + $0x68] sm:$0xff]  ;;  %v217_v19 = vld [vmem:[%s1123_s3 + $0x60] sm:$0xff] }
   0x8   :  { %636 = vmatprep.subr.bf16.mxu1 %v635_v11  ;;  %v639_v17 = vpack.c.bf16 %v218_v16, %v214_v15  ;;  %v641_v20 = vpack.c.bf16 %v217_v19, %v213_v18  ;;  %v222_v21 = vld [vmem:[%s1123_s3 + $0x88] sm:$0xff]  ;;  %v221_v24 = vld [vmem:[%s1123_s3 + $0x80] sm:$0xff]  ;;  %p738_p2 = pnand %p736_p1, %p733_p0 }
   0x9   :  { %638 = vmatpush1.bf16.msra.mxu1 %v637_v14  ;;  %v226_v22 = vld [vmem:[%s1123_s3 + $0xa8] sm:$0xff]  ;;  %v225_v25 = vld [vmem:[%s1123_s3 + $0xa0] sm:$0xff] }
   0xa   :  { %69 = vrot.lane.b32.xlu1 %v33_v3, %s745_s30  ;;  %67 = vrot.lane.b32.xlu0 %v32_v1, %s745_s30  ;;  %v115_v4 = vld [vmem:[#allocation2 + $0x8] sm:$0xff]  ;;  %v643_v23 = vpack.c.bf16 %v226_v22, %v222_v21  ;;  %v645_v26 = vpack.c.bf16 %v225_v25, %v221_v24  ;;  %v229_v30 = vld [vmem:[%s1123_s3 + $0xc0] sm:$0xff]  ;;  %v208_v25 = vld [vmem:[%s1123_s3 + $0x18] sm:$0xff] }
   0xb   :  { %v117_v5 = vld [vmem:[#allocation2 + $0x18] sm:$0xff]  ;;  %640 = vmatprep.subr.bf16.mxu1 %v639_v17  ;;  %v230_v27 = vld [vmem:[%s1123_s3 + $0xc8] sm:$0xff]  ;;  %v233_v31 = vld [vmem:[%s1123_s3 + $0xe0] sm:$0xff] }
   0xc   :  { %v619_v6 = vpack.c.bf16 %v117_v5, %v115_v4  ;;  %v234_v28 = vld [vmem:[%s1123_s3 + $0xe8] sm:$0xff]  ;;  %v649_v32 = vpack.c.bf16 %v233_v31, %v229_v30  ;;  %v237_v36 = vld [vmem:[%s1123_s3 + $0x100] sm:$0xff]  ;;  %v207_v31 = vld [vmem:[%s1123_s3 + $0x10] sm:$0xff] }
   0xd   :  { %642 = vmatpush1.bf16.msra.mxu1 %v641_v20  ;;  %v647_v29 = vpack.c.bf16 %v234_v28, %v230_v27  ;;  %v238_v33 = vld [vmem:[%s1123_s3 + $0x108] sm:$0xff]  ;;  %v241_v37 = vld [vmem:[%s1123_s3 + $0x120] sm:$0xff] }
   0xe   :  { %620 = vmatprep.subr.bf16.mxu0 %v619_v6  ;;  %73 = vrot.lane.b32.xlu1 %v35_v2, %s745_s30  ;;  %v242_v34 = vld [vmem:[%s1123_s3 + $0x128] sm:$0xff]  ;;  %v653_v38 = vpack.c.bf16 %v241_v37, %v237_v36  ;;  %v245_v42 = vld [vmem:[%s1123_s3 + $0x140] sm:$0xff] }
   0xf   :  { %71 = vrot.lane.b32.xlu0 %v34_v0, %s745_s30  ;;  %622 = vmatpush1.bf16.msra.mxu0 %v621_v7  ;;  %v651_v35 = vpack.c.bf16 %v242_v34, %v238_v33  ;;  %v246_v39 = vld [vmem:[%s1123_s3 + $0x148] sm:$0xff]  ;;  %v249_v43 = vld [vmem:[%s1123_s3 + $0x160] sm:$0xff]  ;;  %v216_v34 = vld [vmem:[%s1123_s3 + $0x58] sm:$0xff] }
  0x10   :  { %644 = vmatprep.subr.bf16.mxu1 %v643_v23  ;;  %v250_v40 = vld [vmem:[%s1123_s3 + $0x168] sm:$0xff]  ;;  %v657_v44 = vpack.c.bf16 %v249_v43, %v245_v42  ;;  %v253_v48 = vld [vmem:[%s1123_s3 + $0x180] sm:$0xff]  ;;  %v228_v42 = vld [vmem:[%s1123_s3 + $0xb8] sm:$0xff] }
  0x11   :  { %646 = vmatpush1.bf16.msra.mxu1 %v645_v26  ;;  %v655_v41 = vpack.c.bf16 %v250_v40, %v246_v39  ;;  %v254_v45 = vld [vmem:[%s1123_s3 + $0x188] sm:$0xff]  ;;  %v257_v49 = vld [vmem:[%s1123_s3 + $0x1a0] sm:$0xff]  ;;  %v212_v26 = vld [vmem:[%s1123_s3 + $0x38] sm:$0xff] }
  0x12   :  { %96 = vrot.lane.b32.xlu1 %v33_v3, %s746_s0  ;;  %648 = vmatprep.subr.bf16.mxu1 %v647_v29  ;;  %v258_v46 = vld [vmem:[%s1123_s3 + $0x1a8] sm:$0xff]  ;;  %v661_v50 = vpack.c.bf16 %v257_v49, %v253_v48  ;;  %v261_v54 = vld [vmem:[%s1123_s3 + $0x1c0] sm:$0xff]  ;;  %v671_v30 = vpack.c.bf16 %v212_v26, %v208_v25  ;;  %v215_v39 = vld [vmem:[%s1123_s3 + $0x50] sm:$0xff]  ;;  %v748_v25 = vmov 0  }
  0x13   :  { %94 = vrot.lane.b32.xlu0 %v32_v1, %s746_s0  ;;  %v659_v47 = vpack.c.bf16 %v258_v46, %v254_v45  ;;  %v262_v51 = vld [vmem:[%s1123_s3 + $0x1c8] sm:$0xff]  ;;  %v265_v55 = vld [vmem:[%s1123_s3 + $0x1e0] sm:$0xff]  ;;  %v219_v40 = vld [vmem:[%s1123_s3 + $0x70] sm:$0xff] }
  0x14   :  { %v266_v52 = vld [vmem:[%s1123_s3 + $0x1e8] sm:$0xff]  ;;  %v665_v56 = vpack.c.bf16 %v265_v55, %v261_v54  ;;  %v269_v60 = vld [vmem:[%s1123_s3 + $0x200] sm:$0xff]  ;;  %v677_v43 = vpack.c.bf16 %v219_v40, %v215_v39  ;;  %v223_v45 = vld [vmem:[%s1123_s3 + $0x90] sm:$0xff]  ;;  %715 = vset.pattern.permute.xlu0 %v748_v25 }
  0x15   :  { %650 = vmatpush1.bf16.msra.mxu1 %v649_v32  ;;  %v663_v53 = vpack.c.bf16 %v266_v52, %v262_v51  ;;  %v270_v57 = vld [vmem:[%s1123_s3 + $0x208] sm:$0xff]  ;;  %v273_v61 = vld [vmem:[%s1123_s3 + $0x220] sm:$0xff]  ;;  %v211_v32 = vld [vmem:[%s1123_s3 + $0x30] sm:$0xff] }
  0x16   :  { %100 = vrot.lane.b32.xlu1 %v35_v2, %s746_s0  ;;  %652 = vmatprep.subr.bf16.mxu1 %v651_v35  ;;  %v274_v58 = vld [vmem:[%s1123_s3 + $0x228] sm:$0xff]  ;;  %v669_v62 = vpack.c.bf16 %v273_v61, %v269_v60  ;;  %v220_v35 = vld [vmem:[%s1123_s3 + $0x78] sm:$0xff]  ;;  %v113_v36 = vld [vmem:[%s1121_s1] sm:$0x1f]  ;;  %v673_v37 = vpack.c.bf16 %v211_v32, %v207_v31 }
  0x17   :  { %98 = vrot.lane.b32.xlu0 %v34_v0, %s746_s0  ;;  %v667_v59 = vpack.c.bf16 %v274_v58, %v270_v57  ;;  %v227_v46 = vld [vmem:[%s1123_s3 + $0xb0] sm:$0xff]  ;;  %v236_v48 = vld [vmem:[%s1123_s3 + $0xf8] sm:$0xff] }
  0x18   :  { %v681_v49 = vpack.c.bf16 %v227_v46, %v223_v45  ;;  %v231_v51 = vld [vmem:[%s1123_s3 + $0xd0] sm:$0xff]  ;;  %v244_v54 = vld [vmem:[%s1123_s3 + $0x138] sm:$0xff] }
  0x19   :  { %654 = vmatpush1.bf16.msra.mxu1 %v653_v38  ;;  %v675_v38 = vpack.c.bf16 %v220_v35, %v216_v34  ;;  %v235_v52 = vld [vmem:[%s1123_s3 + $0xf0] sm:$0xff]  ;;  %v252_v60 = vld [vmem:[%s1123_s3 + $0x178] sm:$0xff] }
  0x1a   :  { %656 = vmatprep.subr.bf16.mxu1 %v655_v41  ;;  %v224_v41 = vld [vmem:[%s1123_s3 + $0x98] sm:$0xff]  ;;  %v685_v55 = vpack.c.bf16 %v235_v52, %v231_v51  ;;  %v239_v57 = vld [vmem:[%s1123_s3 + $0x110] sm:$0xff] }
  0x1b   :  { %v243_v58 = vld [vmem:[%s1123_s3 + $0x130] sm:$0xff] }
  0x1c   :  { %v689_v61 = vpack.c.bf16 %v243_v58, %v239_v57 }
  0x1d   :  { %658 = vmatpush1.bf16.msra.mxu1 %v657_v44  ;;  %v679_v44 = vpack.c.bf16 %v228_v42, %v224_v41 }
  0x1e   :  { %660 = vmatprep.subr.bf16.mxu1 %v659_v47  ;;  %v232_v47 = vld [vmem:[%s1123_s3 + $0xd8] sm:$0xff] }
  0x21   :  { %662 = vmatpush1.bf16.msra.mxu1 %v661_v50  ;;  %v683_v50 = vpack.c.bf16 %v236_v48, %v232_v47 }
  0x22   :  { %664 = vmatprep.subr.bf16.mxu1 %v663_v53  ;;  %v240_v53 = vld [vmem:[%s1123_s3 + $0x118] sm:$0xff] }
  0x25   :  { %666 = vmatpush1.bf16.msra.mxu1 %v665_v56  ;;  %v687_v56 = vpack.c.bf16 %v244_v54, %v240_v53  ;;  %v518_v54 = vlaneseq }
  0x26   :  { %668 = vmatprep.subr.bf16.mxu1 %v667_v59  ;;  %v248_v59 = vld [vmem:[%s1123_s3 + $0x158] sm:$0xff] }
  0x29   :  { %670 = vmatpush1.bf16.msra.mxu1 %v669_v62  ;;  %v691_v62 = vpack.c.bf16 %v252_v60, %v248_v59 }
  0x74   :  { %v45_v63 = vpop.permute.xlu1 %44  ;;  %v41_v0 = vpop.permute.xlu0 %40 }
  0x78   :  { %v47_v1 = vpop.permute.xlu1 %46  ;;  %v43_v2 = vpop.permute.xlu0 %42 }
  0x79   :  { %v50_v3 = vsel %vm48_vm1, %v45_v63, %v47_v1  ;;  %58 = vst.msk [vmem:[#allocation2 + $0x38] sm:$0xff] %vm28_vm0, %v47_v1  ;;  %v49_v4 = vsel %vm48_vm1, %v41_v0, %v43_v2  ;;  %56 = vst.msk [vmem:[#allocation2 + $0x28] sm:$0xff] %vm28_vm0, %v43_v2  ;;  %v247_v63 = vld [vmem:[%s1123_s3 + $0x150] sm:$0xff]  ;;  %v256_v1 = vld [vmem:[%s1123_s3 + $0x198] sm:$0xff] }
  0x7a   :  { %v625_v14 = vpack.c.bf16 %v50_v3, %v49_v4  ;;  %v251_v0 = vld [vmem:[%s1123_s3 + $0x170] sm:$0xff]  ;;  %v260_v2 = vld [vmem:[%s1123_s3 + $0x1b8] sm:$0xff] }
  0x7b   :  { %v693_v3 = vpack.c.bf16 %v251_v0, %v247_v63  ;;  %v695_v4 = vpack.c.bf16 %v260_v2, %v256_v1  ;;  %v519_v63 = vshrl.u32 %v518_v54, 7 }
  0x7c   :  { %v70_v5 = vpop.permute.xlu1 %69  ;;  %v68_v6 = vpop.permute.xlu0 %67 }
  0x7d   :  { %83 = vst.msk [vmem:[#allocation2 + $0x48] sm:$0xff] %vm28_vm0, %v70_v5  ;;  %v76_v7 = vsel %vm75_vm2, %v68_v6, %v70_v5  ;;  %v255_v5 = vld [vmem:[%s1123_s3 + $0x190] sm:$0xff] }
  0x7e   :  { %v259_v6 = vld [vmem:[%s1123_s3 + $0x1b0] sm:$0xff] }
  0x80   :  { %v74_v8 = vpop.permute.xlu1 %73  ;;  %v119_v10 = vld [vmem:[#allocation2 + $0x28] sm:$0xff]  ;;  %v121_v11 = vld [vmem:[#allocation2 + $0x38] sm:$0xff] }
  0x81   :  { %v72_v9 = vpop.permute.xlu0 %71  ;;  %85 = vst.msk [vmem:[#allocation2 + $0x58] sm:$0xff] %vm28_vm0, %v74_v8  ;;  %v623_v13 = vpack.c.bf16 %v121_v11, %v119_v10  ;;  %v263_v11 = vld [vmem:[%s1123_s3 + $0x1d0] sm:$0xff] }
  0x82   :  { %v77_v12 = vsel %vm75_vm2, %v72_v9, %v74_v8  ;;  %v268_v8 = vld [vmem:[%s1123_s3 + $0x1f8] sm:$0xff]  ;;  %v697_v9 = vpack.c.bf16 %v259_v6, %v255_v5 }
  0x83   :  { %624 = vmatprep.subr.bf16.mxu0 %v623_v13  ;;  %v629_v24 = vpack.c.bf16 %v77_v12, %v76_v7  ;;  %v264_v7 = vld [vmem:[%s1123_s3 + $0x1d8] sm:$0xff]  ;;  %v267_v12 = vld [vmem:[%s1123_s3 + $0x1f0] sm:$0xff] }
  0x84   :  { %v97_v15 = vpop.permute.xlu1 %96  ;;  %626 = vmatpush1.bf16.msra.mxu0 %v625_v14  ;;  %v123_v20 = vld [vmem:[#allocation2 + $0x48] sm:$0xff]  ;;  %v699_v10 = vpack.c.bf16 %v268_v8, %v264_v7  ;;  %v272_v13 = vld [vmem:[%s1123_s3 + $0x218] sm:$0xff]  ;;  %v523_v8 = vsub.s32 0, %v519_v63 }
  0x85   :  { %v95_v16 = vpop.permute.xlu0 %94  ;;  %110 = vst.msk [vmem:[#allocation2 + $0x68] sm:$0xff] %vm28_vm0, %v97_v15  ;;  %v276_v14 = vld [vmem:[%s1123_s3 + $0x238] sm:$0xff] }
  0x86   :  { %v103_v17 = vsel %vm102_vm3, %v95_v16, %v97_v15  ;;  %v701_v15 = vpack.c.bf16 %v267_v12, %v263_v11  ;;  %v703_v16 = vpack.c.bf16 %v276_v14, %v272_v13  ;;  %v520_v11 = vld [vmem:[%s1124_s4] sm:$0xf]  ;;  %v531_v12 = vsub.s32 2, %v519_v63 }
  0x87   :  { %v527_v13 = vsub.s32 1, %v519_v63 }
  0x88   :  { %v101_v18 = vpop.permute.xlu1 %100  ;;  %v125_v21 = vld [vmem:[#allocation2 + $0x58] sm:$0xff] }
  0x89   :  { %v99_v19 = vpop.permute.xlu0 %98  ;;  %112 = vst.msk [vmem:[#allocation2 + $0x78] sm:$0xff] %vm28_vm0, %v101_v18  ;;  %v627_v23 = vpack.c.bf16 %v125_v21, %v123_v20  ;;  %v278_v20 = vld [vmem:[%s1123_s3 + $0x248] sm:$0xff]  ;;  %v280_v21 = vld [vmem:[%s1123_s3 + $0x258] sm:$0xff] }
  0x8a   :  { %v104_v22 = vsel %vm102_vm3, %v99_v19, %v101_v18  ;;  %v275_v18 = vld [vmem:[%s1123_s3 + $0x230] sm:$0xff]  ;;  %326 = vmatprep.subr.mxu1 %v278_v20 }
  0x8b   :  { %628 = vmatprep.subr.bf16.mxu0 %v627_v23  ;;  %v633_v33 = vpack.c.bf16 %v104_v22, %v103_v17  ;;  %v271_v17 = vld [vmem:[%s1123_s3 + $0x210] sm:$0xff]  ;;  %v277_v22 = vld [vmem:[%s1123_s3 + $0x240] sm:$0xff] }
  0x8c   :  { %630 = vmatpush1.bf16.msra.mxu0 %v629_v24  ;;  %v127_v27 = vld [vmem:[#allocation2 + $0x68] sm:$0xff]  ;;  %v705_v19 = vpack.c.bf16 %v275_v18, %v271_v17  ;;  %v279_v23 = vld [vmem:[%s1123_s3 + $0x250] sm:$0xff]  ;;  %327 = vmatpush1.msra.mxu1 %v277_v22  ;;  %v281_v24 = vld [vmem:[%s1122_s2] sm:$0x1f]  ;;  %v532_v17 = vrot.slane %v520_v11, %v531_v12  ;;  %v528_v18 = vrot.slane %v520_v11, %v527_v13 }
  0x8d   :  { %284 = vperm.xlu0 %715, %v281_v24  }
  0x8e   :  { %vm539_vm7 = vcmp.eq.s32.totalorder %v519_v63, %v532_v17  ;;  %vm538_vm8 = vcmp.eq.s32.totalorder %v519_v63, %v528_v18 }
  0x90   :  { %v129_v28 = vld [vmem:[#allocation2 + $0x78] sm:$0xff] }
  0x91   :  { %v631_v29 = vpack.c.bf16 %v129_v28, %v127_v27 }
  0x93   :  { %632 = vmatprep.subr.bf16.mxu0 %v631_v29 }
  0x94   :  { %634 = vmatpush1.bf16.msra.mxu0 %v633_v33 }
  0x95   :  { %672 = vmatprep.subr.bf16.mxu0 %v671_v30 }
  0x97   :  { %614 = vmatmul.mubr.msk.f32.vlgmr.msra.gmra.mrb[0].mxu0 %vm130_vm4, %v113_v36 }
  0x98   :  { %674 = vmatpush1.bf16.msra.mxu0 %v673_v37 }
  0x99   :  { %676 = vmatprep.subr.bf16.mxu0 %v675_v38 }
  0x9c   :  { %678 = vmatpush1.bf16.msra.mxu0 %v677_v43 }
  0x9d   :  { %680 = vmatprep.subr.bf16.mxu0 %v679_v44 }
  0xa0   :  { %682 = vmatpush1.bf16.msra.mxu0 %v681_v49 }
  0xa1   :  { %684 = vmatprep.subr.bf16.mxu0 %v683_v50 }
  0xa4   :  { %686 = vmatpush1.bf16.msra.mxu0 %v685_v55 }
  0xa5   :  { %688 = vmatprep.subr.bf16.mxu0 %v687_v56 }
  0xa8   :  { %690 = vmatpush1.bf16.msra.mxu0 %v689_v61 }
  0xa9   :  { %692 = vmatprep.subr.bf16.mxu0 %v691_v62 }
  0xac   :  { %694 = vmatpush1.bf16.msra.mxu0 %v693_v3 }
  0xad   :  { %696 = vmatprep.subr.bf16.mxu0 %v695_v4 }
  0xb0   :  { %698 = vmatpush1.bf16.msra.mxu0 %v697_v9 }
  0xb1   :  { %700 = vmatprep.subr.bf16.mxu0 %v699_v10 }
  0xb4   :  { %702 = vmatpush1.bf16.msra.mxu0 %v701_v15  ;;  %v535_v15 = vsub.s32 3, %v519_v63 }
  0xb5   :  { %704 = vmatprep.subr.bf16.mxu0 %v703_v16  ;;  %v524_v16 = vrot.slane %v520_v11, %v523_v8 }
  0xb7   :  { %vm537_vm6 = vcmp.eq.s32.totalorder %v519_v63, %v524_v16 }
  0xb8   :  { %706 = vmatpush1.bf16.msra.mxu0 %v705_v19  ;;  %v536_v19 = vrot.slane %v520_v11, %v535_v15 }
  0xb9   :  { %397 = vmatprep.subr.mxu0 %v280_v21 }
  0xba   :  { %vm540_vm9 = vcmp.eq.s32.totalorder %v519_v63, %v536_v19 }
  0xbc   :  { %398 = vmatpush1.msra.mxu0 %v279_v23 }
 0x10c   :  { %v285_v28 = vpop.permute.xlu0 %284 }
 0x16a   :  { %v200_v26 = vpop.f32.mrb[0].mxu0 }
 0x16b   :  { %v202_v27 = vpop.f32.mrb[1].mxu0 }
 0x16c   :  { %615 = vmatprep.mubr.msk.f32.mxu1 %vm28_vm0, %v202_v27  ;;  %616 = vmatprep.mubr.msk.f32.mxu0 %vm28_vm0, %v202_v27 }
 0x16d   :  { %355 = vmatmul.mubr.f32.vlgmr.msra.gmra.mrb[0].mxu1 %v200_v26  ;;  %426 = vmatmul.mubr.f32.vlgmr.msra.gmra.mrb[2].mxu0 %v200_v26 }
 0x240   :  { %v356_v29 = vpop.f32.mrb[0].mxu1  ;;  %v427_v30 = vpop.f32.mrb[2].mxu0 }
 0x241   :  { %v1041_v31 = vadd.f32 %v356_v29, %v285_v28  ;;  %v1043_v32 = vadd.f32 %v427_v30, %v285_v28  ;;  %v358_v33 = vpop.f32.mrb[1].mxu1  ;;  %v429_v34 = vpop.f32.mrb[3].mxu0 }
 0x242   :  { %v1045_v35 = vadd.f32 %v358_v33, %v285_v28  ;;  %v1047_v36 = vadd.f32 %v429_v34, %v285_v28 }
 0x243   :  { %432 = vst [vmem:[%s1125_s5] sm:$0x1f] %v1041_v31  ;;  %v438_v37 = vsel %vm437_vm5, %v1041_v31, -inf  ;;  %617 = vst [vmem:[%s1125_s5 + $0x10] sm:$0x1f] %v1043_v32  ;;  %v452_v38 = vsel %vm437_vm5, %v1043_v32, -inf  ;;  %v541_v23 = vsel %vm537_vm6, %v1041_v31, 0.0 }
 0x244   :  { %v439_v39 = vrot.slane %v438_v37, 4  ;;  %v453_v40 = vrot.slane %v452_v38, 4  ;;  %433 = vst [vmem:[%s1125_s5 + $0x8] sm:$0x1f] %v1045_v35  ;;  %618 = vst [vmem:[%s1125_s5 + $0x18] sm:$0x1f] %v1047_v36 }
 0x245   :  { %v445_v41 = vsel %vm437_vm5, %v1045_v35, -inf  ;;  %v459_v45 = vsel %vm437_vm5, %v1047_v36, -inf  ;;  %v543_v26 = vsel %vm539_vm7, %v1043_v32, 0.0  ;;  %v542_v29 = vsel %vm538_vm8, %v1045_v35, 0.0 }
 0x246   :  { %v440_v42 = vmax.f32 %v438_v37, %v439_v39  ;;  %v454_v43 = vmax.f32 %v452_v38, %v453_v40  ;;  %v446_v44 = vrot.slane %v445_v41, 4  ;;  %v460_v49 = vrot.slane %v459_v45, 4 }
 0x247   :  { %v545_v34 = vsel %vm437_vm5, %v541_v23, 0.0  ;;  %v544_v38 = vsel %vm540_vm9, %v1047_v36, 0.0 }
 0x248   :  { %v441_v46 = vrot.slane %v440_v42, 2  ;;  %v455_v47 = vrot.slane %v454_v43, 2  ;;  %v447_v48 = vmax.f32 %v445_v41, %v446_v44  ;;  %v461_v53 = vmax.f32 %v459_v45, %v460_v49 }
 0x249   :  { %v546_v45 = vrot.slane %v545_v34, 4 }
 0x24a   :  { %v442_v50 = vmax.f32 %v440_v42, %v441_v46  ;;  %v456_v51 = vmax.f32 %v454_v43, %v455_v47  ;;  %v448_v52 = vrot.slane %v447_v48, 2  ;;  %v462_v58 = vrot.slane %v461_v53, 2 }
 0x24c   :  { %v443_v55 = vrot.slane %v442_v50, 1  ;;  %v457_v56 = vrot.slane %v456_v51, 1  ;;  %v449_v57 = vmax.f32 %v447_v48, %v448_v52  ;;  %v463_v62 = vmax.f32 %v461_v53, %v462_v58 }
 0x24e   :  { %v1073_v59 = vmax.f32 %v442_v50, %v443_v55  ;;  %v1075_v60 = vmax.f32 %v456_v51, %v457_v56  ;;  %v450_v61 = vrot.slane %v449_v57, 1  ;;  %v464_v3 = vrot.slane %v463_v62, 1 }
 0x24f   :  { %v547_v56 = vadd.f32 %v546_v45, %v545_v34 }
 0x250   :  { %v466_v0 = vsub.f32 %v1041_v31, %v1073_v59  ;;  %v468_v1 = vsub.f32 %v1043_v32, %v1075_v60  ;;  %v1081_v2 = vmax.f32 %v449_v57, %v450_v61  ;;  %v1085_v7 = vmax.f32 %v463_v62, %v464_v3 }
 0x251   :  { %v559_v31 = vsel %vm437_vm5, %v543_v26, 0.0  ;;  %v552_v32 = vsel %vm437_vm5, %v542_v29, 0.0 }
 0x252   :  { %v470_v4 = vmul.f32 1.442695, %v466_v0  ;;  %v474_v5 = vmul.f32 1.442695, %v468_v1  ;;  %v467_v6 = vsub.f32 %v1045_v35, %v1081_v2  ;;  %v469_v10 = vsub.f32 %v1047_v36, %v1085_v7 }
 0x253   :  { %v566_v35 = vsel %vm437_vm5, %v544_v38, 0.0  ;;  %v560_v47 = vrot.slane %v559_v31, 4  ;;  %v553_v36 = vrot.slane %v552_v32, 4 }
 0x254   :  { %716 = vpow2.f32 %v470_v4  ;;  %v472_v9 = vmul.f32 1.442695, %v467_v6  ;;  %v476_v14 = vmul.f32 1.442695, %v469_v10  ;;  %v567_v52 = vrot.slane %v566_v35, 4 }
 0x255   :  { %718 = vpow2.f32 %v474_v5  ;;  %v561_v58 = vadd.f32 %v560_v47, %v559_v31  ;;  %v554_v0 = vadd.f32 %v553_v36, %v552_v32  ;;  %v548_v6 = vrot.slane %v547_v56, 2 }
 0x256   :  { %720 = vpow2.f32 %v472_v9  ;;  %v568_v5 = vadd.f32 %v567_v52, %v566_v35 }
 0x257   :  { %722 = vpow2.f32 %v476_v14  ;;  %v562_v9 = vrot.slane %v561_v58, 2  ;;  %v555_v10 = vrot.slane %v554_v0, 2  ;;  %v549_v12 = vadd.f32 %v548_v6, %v547_v56 }
 0x258   :  { %v569_v11 = vrot.slane %v568_v5, 2 }
 0x259   :  { %v563_v13 = vadd.f32 %v562_v9, %v561_v58  ;;  %v556_v14 = vadd.f32 %v555_v10, %v554_v0  ;;  %v550_v16 = vrot.slane %v549_v12, 1 }
 0x25a   :  { %v570_v15 = vadd.f32 %v569_v11, %v568_v5 }
 0x25b   :  { %v564_v18 = vrot.slane %v563_v13, 1 }
 0x25e   :  { %v717_v20 = vpop.eup %716 }
 0x25f   :  { %v719_v21 = vpop.eup %718  ;;  %v478_v22 = vsel %vm437_vm5, %v717_v20, 0.0 }
 0x260   :  { %v721_v24 = vpop.eup %720  ;;  %v479_v25 = vrot.slane %v478_v22, 4  ;;  %v492_v27 = vsel %vm437_vm5, %v719_v21, 0.0  ;;  %v557_v21 = vrot.slane %v556_v14, 1 }
 0x261   :  { %v485_v28 = vsel %vm437_vm5, %v721_v24, 0.0  ;;  %v493_v30 = vrot.slane %v492_v27, 4  ;;  %v723_v33 = vpop.eup %722  ;;  %v571_v24 = vrot.slane %v570_v15, 1 }
 0x262   :  { %v486_v37 = vrot.slane %v485_v28, 4  ;;  %v480_v39 = vadd.f32 %v479_v25, %v478_v22  ;;  %v499_v41 = vsel %vm437_vm5, %v723_v33, 0.0 }
 0x263   :  { %v494_v40 = vadd.f32 %v493_v30, %v492_v27  ;;  %v500_v44 = vrot.slane %v499_v41, 4  ;;  %v551_v27 = vadd.f32 %v550_v16, %v549_v12  ;;  %v565_v30 = vadd.f32 %v564_v18, %v563_v13 }
 0x264   :  { %v481_v42 = vrot.slane %v480_v39, 2  ;;  %v487_v43 = vadd.f32 %v486_v37, %v485_v28  ;;  %v558_v37 = vadd.f32 %v557_v21, %v556_v14 }
 0x265   :  { %v495_v46 = vrot.slane %v494_v40, 2  ;;  %v501_v50 = vadd.f32 %v500_v44, %v499_v41 }
 0x266   :  { %v482_v48 = vadd.f32 %v481_v42, %v480_v39  ;;  %v488_v49 = vrot.slane %v487_v43, 2  ;;  %v572_v39 = vadd.f32 %v571_v24, %v570_v15 }
 0x267   :  { %v496_v51 = vadd.f32 %v495_v46, %v494_v40  ;;  %v502_v55 = vrot.slane %v501_v50, 2 }
 0x268   :  { %v483_v53 = vrot.slane %v482_v48, 1  ;;  %v489_v54 = vadd.f32 %v488_v49, %v487_v43 }
 0x269   :  { %v497_v57 = vrot.slane %v496_v51, 1  ;;  %v503_v63 = vadd.f32 %v502_v55, %v501_v50 }
 0x26a   :  { %v484_v61 = vadd.f32 %v483_v53, %v482_v48  ;;  %v490_v62 = vrot.slane %v489_v54, 1 }
 0x26b   :  { %v498_v1 = vadd.f32 %v497_v57, %v496_v51  ;;  %v504_v4 = vrot.slane %v503_v63, 1 }
 0x26c   :  { %v491_v3 = vadd.f32 %v490_v62, %v489_v54  ;;  %724 = vlog2.f32 %v484_v61 }
 0x26d   :  { %726 = vlog2.f32 %v498_v1  ;;  %v505_v8 = vadd.f32 %v504_v4, %v503_v63 }
 0x26e   :  { %728 = vlog2.f32 %v491_v3 }
 0x26f   :  { %730 = vlog2.f32 %v505_v8 }
 0x276   :  { %v725_v17 = vpop.eup %724 }
 0x277   :  { %v727_v19 = vpop.eup %726  ;;  %v507_v20 = vmul.f32 0.6931472, %v725_v17 }
 0x278   :  { %v729_v22 = vpop.eup %728  ;;  %v511_v23 = vmul.f32 0.6931472, %v727_v19 }
 0x279   :  { %v509_v25 = vmul.f32 0.6931472, %v729_v22  ;;  %v514_v26 = vadd.f32 %v507_v20, %v1073_v59  ;;  %v731_v28 = vpop.eup %730 }
 0x27a   :  { %v516_v29 = vadd.f32 %v511_v23, %v1075_v60  ;;  %v513_v33 = vmul.f32 0.6931472, %v731_v28 }
 0x27b   :  { %v515_v34 = vadd.f32 %v509_v25, %v1081_v2  ;;  %v573_v38 = vsub.f32 %v514_v26, %v551_v27 }
 0x27c   :  { %v517_v31 = vadd.f32 %v513_v33, %v1085_v7  ;;  %v575_v41 = vsub.f32 %v516_v29, %v565_v30 }
 0x27d   :  { %v574_v40 = vsub.f32 %v515_v34, %v558_v37  ;;  %v578_v32 = vsel %vm577_vm10, %v573_v38, 0.0 }
 0x27e   :  { %v576_v42 = vsub.f32 %v517_v31, %v572_v39  ;;  %v581_v44 = vsel %vm577_vm10, %v575_v41, 0.0 }
 0x27f   :  { %v579_v43 = vsel %vm577_vm10, %v574_v40, 0.0 }
 0x280   :  { %v580_v59 = vadd.f32 %v579_v43, %v578_v32  ;;  %v583_v35 = vsel %vm577_vm10, %v576_v42, 0.0 }
 0x282   :  { %v582_v45 = vadd.f32 %v581_v44, %v580_v59 }
 0x284   :  { %v584_v60 = vadd.f32 %v583_v35, %v582_v45 }
 0x286   :  { %585 = vadd.xlane.f32.xlu1 %v584_v60 }
 0x313   :  { %v586_v46 = vpop.xlane.xlu1 %585 }
 0x314   :  { %v587_v47 = vrot.slane %v586_v46, 4 }
 0x316   :  { %v588_v48 = vadd.f32 %v587_v47, %v586_v46 }
 0x318   :  { %v589_v2 = vrot.slane %v588_v48, 2 }
 0x31a   :  { %v590_v49 = vadd.f32 %v589_v2, %v588_v48 }
 0x31c   :  { %v591_v50 = vrot.slane %v590_v49, 1 }
 0x31e   :  { %v592_v36 = vadd.f32 %v591_v50, %v590_v49 }
 0x320   :  { %707 = vpush %v592_v36 }
 0x351   :  { %s708_s4 = spop %707 }
 0x352   :  { %s594_s17 = smul.f32 0.001953125, %s708_s4 }
 0x354   :  { %596 = sst [smem:[#allocation3]] %s594_s17 }
 0x355   :  { %741 = shalt.err (!%p738_p2)
}
 0x356   :  { %s749_s25 = smov [#allocation3]  }
 0x357   :  { %606 = dma.smem_to_hbm %s749_s25, 16, %s1126_s6, [#allocation4]  }
 0x358   :  { %742 = dma.done.wait [#allocation4], 16  }
 0x359   :  { %743 = vsyncadd [#allocation4], 4294967280 }
 0x35a   :  { %612 = sfence }
 0x35b   :  { %613 = vsyncpa [#allocation4], 1 }

</bundles_post_ra>
